<compile_context>
chip_gen: v7x
topology: tpu7x:2x2x1
jax: 0.10.0
libtpu: 0.0.40
codegen_flags: <defaults>
</compile_context>

<pallas_src>
import functools

import jax
import jax.numpy as jnp
from jax.experimental import pallas as pl
from jax.experimental.pallas import tpu as pltpu


def _triplet_tile_kernel(xk_hi_ref, xk_lo_ref, xq_hi_ref, xq_lo_ref,
                         sq_k_ref, sq_q_ref, t_k_ref, t_q_ref,
                         loss_ref, ap2_ref, an2_ref, *, margin):
    j = pl.program_id(1)

    @pl.when(j == 0)
    def _init():
        ap2_ref[...] = jnp.full(ap2_ref.shape, -jnp.inf, dtype=ap2_ref.dtype)
        an2_ref[...] = jnp.full(an2_ref.shape, jnp.inf, dtype=an2_ref.dtype)

    # Gram matrix on the MXU in bf16 with a hi/lo split: x ≈ hi + lo, so
    # <x_k, x_q> ≈ hi_k·hi_q + hi_k·lo_q + lo_k·hi_q  (the lo·lo term is ~1e-5 relative).
    # Three bf16 passes are still several x faster than the multi-pass f32 MXU path.
    gram = jnp.dot(xk_hi_ref[...], xq_hi_ref[...], preferred_element_type=jnp.float32)
    gram += jnp.dot(xk_hi_ref[...], xq_lo_ref[...], preferred_element_type=jnp.float32)
    gram += jnp.dot(xk_lo_ref[...], xq_hi_ref[...], preferred_element_type=jnp.float32)

    # dist^2[k, q] = |x_k|^2 + |x_q|^2 - 2 <x_k, x_q>  (candidates on sublanes, anchors on lanes).
    # Padded candidate rows carry sq_k = +inf (poisoned wrapper-side), so no validity mask here.
    dist2 = sq_k_ref[...] + sq_q_ref[...] - 2.0 * gram            # (TK, TQ), f32

    same = t_k_ref[...] == t_q_ref[...]                           # padded rows never match a real label

    # Running hardest-positive max / hardest-negative min over squared distances (sqrt deferred).
    ap2_ref[...] = jnp.maximum(
        ap2_ref[...],
        jnp.max(jnp.where(same, dist2, -jnp.inf), axis=0, keepdims=True))
    an2_ref[...] = jnp.minimum(
        an2_ref[...],
        jnp.min(jnp.where(same, jnp.inf, dist2), axis=0, keepdims=True))

    @pl.when(j == pl.num_programs(1) - 1)
    def _finalize():
        # Deferred sqrt: only 2*TQ sqrts on the EUP. The 1e-12 clamp matches torch's
        # dist.clamp(min=1e-12).sqrt(); clamp/sqrt are monotone so max/min on dist^2 is exact.
        dist_ap = jnp.sqrt(jnp.maximum(ap2_ref[...], 1e-12))
        dist_an = jnp.sqrt(jnp.maximum(an2_ref[...], 1e-12))
        # MarginRankingLoss with y = 1: max(0, dist_ap - dist_an + margin), per anchor.
        loss_ref[...] = jnp.maximum(dist_ap - dist_an + margin, 0.0)


def _round_up(x, m):
    return ((x + m - 1) // m) * m


def _cdiv(a, b):
    return (a + b - 1) // b


def _vmem_budget_bytes():
    """Generation-aware VMEM planning budget (~48 MiB on v7x, ~96 MiB on v5e/v6e)."""
    try:
        cap = pltpu.get_tpu_info().vmem_capacity_bytes
    except Exception:
        cap = 64 * 1024 * 1024  # conservative fallback (v7x-sized VMEM)
    return int(cap * 0.75)


def _choose_tiles(n, d_pad, budget):
    """Pick (TK candidate tile [sublanes], TQ anchor tile [lanes])."""
    n_pad_base = _round_up(n, 128)
    blocks128 = n_pad_base // 128

    # Anchor tile (lanes): capped at 512, and >= 2 tiles whenever N allows so the
    # "parallel" grid axis can be sharded across both TensorCores on v7x.
    q_per = max(1, min(4, blocks128 // 2)) if blocks128 >= 2 else 1
    tq = 128 * q_per
    n_tiles_q = _cdiv(n_pad_base, tq)
    tq = _round_up(_cdiv(n_pad_base, n_tiles_q), 128)   # re-balance to cut padding waste

    # Candidate tile (sublanes): as large as the VMEM budget allows.  TK == round_up(N,128)
    # means the candidate operands' block index is constant over the whole grid, so they are
    # DMA'd from HBM exactly once (fully resident) — no re-stream per anchor tile.
    # Budget model: double-buffered bf16 hi/lo operands + ~4 f32 (TK,TQ) tile temporaries.
    fixed = 8 * d_pad * tq + 32 * tq + (2 << 20)
    per_tk = 8 * d_pad + 16 * tq
    tk_max = max(128, ((budget - fixed) // per_tk) // 128 * 128)
    if tk_max >= n_pad_base:
        tk = n_pad_base
    else:
        n_tiles_k = _cdiv(n_pad_base, tk_max)
        tk = _round_up(_cdiv(n_pad_base, n_tiles_k), 128)
    return tk, tq


def triplet_loss(inputs, targets, margin=0.3):
    """inputs: (N, D) float features, targets: (N,) int labels -> scalar loss."""
    n, d = inputs.shape

    d_pad = _round_up(max(d, 1), 128)
    budget = _vmem_budget_bytes()
    tk, tq = _choose_tiles(n, d_pad, budget)
    n_pad_k = _round_up(n, tk)   # candidate (sublane) axis padding
    n_pad_q = _round_up(n, tq)   # anchor   (lane)    axis padding

    x = inputs.astype(jnp.float32)

    # Candidate view (rows) and anchor view (wrapper-side transpose; no in-kernel transpose).
    xk = jnp.zeros((n_pad_k, d_pad), jnp.float32).at[:n, :d].set(x)
    xq = jnp.zeros((d_pad, n_pad_q), jnp.float32).at[:d, :n].set(x.T)

    # bf16 hi/lo split of the matmul operands (near-f32 accuracy on the MXU).
    xk_hi = xk.astype(jnp.bfloat16)
    xk_lo = (xk - xk_hi.astype(jnp.float32)).astype(jnp.bfloat16)
    xq_hi = xq.astype(jnp.bfloat16)
    xq_lo = (xq - xq_hi.astype(jnp.float32)).astype(jnp.bfloat16)

    # Squared norms in f32. Padded candidate rows are poisoned with +inf so they lose every
    # hardest-negative min; padded labels are set below a value no real label can take, so
    # they never count as positives.  This removes the per-step validity mask in the kernel.
    sq = jnp.sum(x * x, axis=1)
    sq_k = jnp.full((n_pad_k, 1), jnp.inf, jnp.float32).at[:n, 0].set(sq)
    sq_q = jnp.full((1, n_pad_q), jnp.inf, jnp.float32).at[0, :n].set(sq)

    t = targets.astype(jnp.int32)
    pad_label = jnp.min(t) - 1
    t_k = jnp.full((n_pad_k, 1), pad_label, jnp.int32).at[:n, 0].set(t)
    t_q = jnp.full((1, n_pad_q), pad_label, jnp.int32).at[0, :n].set(t)

    grid = (n_pad_q // tq, n_pad_k // tk)   # (parallel anchor tiles, arbitrary candidate tiles)
    kernel = functools.partial(_triplet_tile_kernel, margin=float(margin))

    per_row = pl.pallas_call(
        kernel,
        out_shape=jax.ShapeDtypeStruct((1, n_pad_q), jnp.float32),
        grid=grid,
        in_specs=[
            pl.BlockSpec((tk, d_pad), lambda i, j: (j, 0)),   # x hi, candidate tile
            pl.BlockSpec((tk, d_pad), lambda i, j: (j, 0)),   # x lo, candidate tile
            pl.BlockSpec((d_pad, tq), lambda i, j: (0, i)),   # x.T hi, anchor tile
            pl.BlockSpec((d_pad, tq), lambda i, j: (0, i)),   # x.T lo, anchor tile
            pl.BlockSpec((tk, 1), lambda i, j: (j, 0)),       # |x|^2, candidate view (poisoned pads)
            pl.BlockSpec((1, tq), lambda i, j: (0, i)),       # |x|^2, anchor view (lane-dense)
            pl.BlockSpec((tk, 1), lambda i, j: (j, 0)),       # labels, candidate view
            pl.BlockSpec((1, tq), lambda i, j: (0, i)),       # labels, anchor view (lane-dense)
        ],
        out_specs=pl.BlockSpec((1, tq), lambda i, j: (0, i)), # lane-dense per-anchor loss
        scratch_shapes=[
            pltpu.VMEM((1, tq), jnp.float32),                 # running max dist_ap^2
            pltpu.VMEM((1, tq), jnp.float32),                 # running min dist_an^2
        ],
        compiler_params=pltpu.CompilerParams(
            dimension_semantics=("parallel", "arbitrary"),
            vmem_limit_bytes=int(budget),
        ),
    )(xk_hi, xk_lo, xq_hi, xq_lo, sq_k, sq_q, t_k, t_q)

    # Mean over the true batch only (padded anchor lanes are discarded).
    return jnp.mean(per_row[0, :n])
    # TODO(synk): mutual_flag=True (returning the full NxN dist matrix) is not implemented.


def _reference(inputs, targets, margin=0.3):
    # Pure-JAX f32 reference mirroring the PyTorch module, for a sanity check.
    sq = jnp.sum(inputs.astype(jnp.float32) ** 2, axis=1, keepdims=True)
    dist = jnp.sqrt(jnp.maximum(sq + sq.T - 2.0 * inputs @ inputs.T, 1e-12))
    mask = targets[:, None] == targets[None, :]
    dist_ap = jnp.max(jnp.where(mask, dist, -jnp.inf), axis=1)
    dist_an = jnp.min(jnp.where(mask, jnp.inf, dist), axis=1)
    return jnp.mean(jnp.maximum(dist_ap - dist_an + margin, 0.0))


if __name__ == "__main__":
    key = jax.random.PRNGKey(0)
    k1, k2 = jax.random.split(key)

    # Case 1: tiny shapes matching the module's (batch, feat_dim) convention -> 1x1 grid.
    n, d = 8, 32
    inputs = jax.random.normal(k1, (n, d), dtype=jnp.float32)
    # 4 identities, 2 samples each -> every row has >=1 positive and >=1 negative.
    targets = jnp.array([0, 0, 1, 1, 2, 2, 3, 3], dtype=jnp.int32)

    loss = triplet_loss(inputs, targets, margin=0.3)
    jax.block_until_ready(loss)
    ref = _reference(inputs, targets, margin=0.3)
    # bf16 hi/lo Gram split is near-f32 but not bit-identical -> 1e-3 tolerance.
    assert jnp.allclose(loss, ref, atol=1e-3, rtol=1e-3), (loss, ref)

    # Case 2: exercises padding/poisoning, 2 anchor tiles (megacore path), resident candidates.
    n2, d2 = 200, 48
    inputs2 = jax.random.normal(k2, (n2, d2), dtype=jnp.float32)
    targets2 = jnp.arange(n2, dtype=jnp.int32) % 10
    loss2 = triplet_loss(inputs2, targets2, margin=0.3)
    jax.block_until_ready(loss2)
    ref2 = _reference(inputs2, targets2, margin=0.3)
    assert jnp.allclose(loss2, ref2, atol=1e-3, rtol=1e-3), (loss2, ref2)

    print("KERNEL_OK")
</pallas_src>

<mosaic_0001>
module attributes {stable_mosaic.version = 11 : i64} {
  func.func @_triplet_tile_kernel(%arg0: i32, %arg1: i32, %arg2: memref<128x128xbf16, #tpu.memory_space<vmem>>, %arg3: memref<128x128xbf16, #tpu.memory_space<vmem>>, %arg4: memref<128x128xbf16, #tpu.memory_space<vmem>>, %arg5: memref<128x128xbf16, #tpu.memory_space<vmem>>, %arg6: memref<128x1xf32, #tpu.memory_space<vmem>>, %arg7: memref<1x128xf32, #tpu.memory_space<vmem>>, %arg8: memref<128x1xi32, #tpu.memory_space<vmem>>, %arg9: memref<1x128xi32, #tpu.memory_space<vmem>>, %arg10: memref<1x128xf32, #tpu.memory_space<vmem>>, %arg11: memref<1x128xf32, #tpu.memory_space<vmem>>, %arg12: memref<1x128xf32, #tpu.memory_space<vmem>>) attributes {dimension_semantics = [#tpu.dimension_semantics<parallel>, #tpu.dimension_semantics<arbitrary>], iteration_bounds = array<i64: 1, 1>, scalar_prefetch = 0 : i64, scratch_operands = 2 : i64, tpu.core_type = #tpu.core_type<tc>, window_params = [{transform_indices = @transform_0, window_bounds = array<i64: 128, 128>}, {transform_indices = @transform_1, window_bounds = array<i64: 128, 128>}, {transform_indices = @transform_2, window_bounds = array<i64: 128, 128>}, {transform_indices = @transform_3, window_bounds = array<i64: 128, 128>}, {transform_indices = @transform_4, window_bounds = array<i64: 128, 1>}, {transform_indices = @transform_5, window_bounds = array<i64: 1, 128>}, {transform_indices = @transform_6, window_bounds = array<i64: 128, 1>}, {transform_indices = @transform_7, window_bounds = array<i64: 1, 128>}, {transform_indices = @transform_8, window_bounds = array<i64: 1, 128>}]} {
    %c0_i32 = arith.constant 0 : i32
    %0 = arith.cmpi eq, %arg1, %c0_i32 : i32
    %1 = arith.extui %0 : i1 to i32
    %c0_i32_0 = arith.constant 0 : i32
    %2 = arith.cmpi ne, %1, %c0_i32_0 : i32
    scf.if %2 {
      %cst_37 = arith.constant 0xFF800000 : f32
      %44 = vector.broadcast %cst_37 : f32 to vector<1x128xf32>
      %c0_38 = arith.constant 0 : index
      %c0_39 = arith.constant 0 : index
      %45 = vector.load %arg11[%c0_38, %c0_39] : memref<1x128xf32, #tpu.memory_space<vmem>>, vector<1x128xf32>
      tpu.vector_store %arg11[%c0_38, %c0_39], %44 {strides = array<i32>} : memref<1x128xf32, #tpu.memory_space<vmem>>, vector<1x128xf32>,
      %cst_40 = arith.constant 0x7F800000 : f32
      %46 = vector.broadcast %cst_40 : f32 to vector<1x128xf32>
      %c0_41 = arith.constant 0 : index
      %c0_42 = arith.constant 0 : index
      %47 = vector.load %arg12[%c0_41, %c0_42] : memref<1x128xf32, #tpu.memory_space<vmem>>, vector<1x128xf32>
      tpu.vector_store %arg12[%c0_41, %c0_42], %46 {strides = array<i32>} : memref<1x128xf32, #tpu.memory_space<vmem>>, vector<1x128xf32>,
    } else {
    }
    %c0 = arith.constant 0 : index
    %c0_1 = arith.constant 0 : index
    %3 = vector.load %arg2[%c0, %c0_1] : memref<128x128xbf16, #tpu.memory_space<vmem>>, vector<128x128xbf16>
    %c0_2 = arith.constant 0 : index
    %c0_3 = arith.constant 0 : index
    %4 = vector.load %arg4[%c0_2, %c0_3] : memref<128x128xbf16, #tpu.memory_space<vmem>>, vector<128x128xbf16>
    %cst = arith.constant dense<0.000000e+00> : vector<128x128xf32>
    %5 = tpu.matmul %3, %4, %cst {dimension_numbers = #tpu.dot_dimension_numbers<[1], [0], [0], [1], [0, 0, 1, 1], [], []>} : vector<128x128xbf16>, vector<128x128xbf16>, vector<128x128xf32> -> vector<128x128xf32>
    %c0_4 = arith.constant 0 : index
    %c0_5 = arith.constant 0 : index
    %6 = vector.load %arg2[%c0_4, %c0_5] : memref<128x128xbf16, #tpu.memory_space<vmem>>, vector<128x128xbf16>
    %c0_6 = arith.constant 0 : index
    %c0_7 = arith.constant 0 : index
    %7 = vector.load %arg5[%c0_6, %c0_7] : memref<128x128xbf16, #tpu.memory_space<vmem>>, vector<128x128xbf16>
    %cst_8 = arith.constant dense<0.000000e+00> : vector<128x128xf32>
    %8 = tpu.matmul %6, %7, %cst_8 {dimension_numbers = #tpu.dot_dimension_numbers<[1], [0], [0], [1], [0, 0, 1, 1], [], []>} : vector<128x128xbf16>, vector<128x128xbf16>, vector<128x128xf32> -> vector<128x128xf32>
    %9 = arith.addf %5, %8 : vector<128x128xf32>
    %c0_9 = arith.constant 0 : index
    %c0_10 = arith.constant 0 : index
    %10 = vector.load %arg3[%c0_9, %c0_10] : memref<128x128xbf16, #tpu.memory_space<vmem>>, vector<128x128xbf16>
    %c0_11 = arith.constant 0 : index
    %c0_12 = arith.constant 0 : index
    %11 = vector.load %arg4[%c0_11, %c0_12] : memref<128x128xbf16, #tpu.memory_space<vmem>>, vector<128x128xbf16>
    %cst_13 = arith.constant dense<0.000000e+00> : vector<128x128xf32>
    %12 = tpu.matmul %10, %11, %cst_13 {dimension_numbers = #tpu.dot_dimension_numbers<[1], [0], [0], [1], [0, 0, 1, 1], [], []>} : vector<128x128xbf16>, vector<128x128xbf16>, vector<128x128xf32> -> vector<128x128xf32>
    %13 = arith.addf %9, %12 : vector<128x128xf32>
    %c0_14 = arith.constant 0 : index
    %c0_15 = arith.constant 0 : index
    %14 = vector.load %arg6[%c0_14, %c0_15] : memref<128x1xf32, #tpu.memory_space<vmem>>, vector<128x1xf32>
    %c0_16 = arith.constant 0 : index
    %c0_17 = arith.constant 0 : index
    %15 = vector.load %arg7[%c0_16, %c0_17] : memref<1x128xf32, #tpu.memory_space<vmem>>, vector<1x128xf32>
    %16 = vector.broadcast %14 : vector<128x1xf32> to vector<128x128xf32>
    %17 = vector.broadcast %15 : vector<1x128xf32> to vector<128x128xf32>
    %18 = arith.addf %16, %17 : vector<128x128xf32>
    %cst_18 = arith.constant 2.000000e+00 : f32
    %19 = vector.broadcast %cst_18 : f32 to vector<128x128xf32>
    %20 = arith.mulf %19, %13 : vector<128x128xf32>
    %21 = arith.subf %18, %20 : vector<128x128xf32>
    %c0_19 = arith.constant 0 : index
    %c0_20 = arith.constant 0 : index
    %22 = vector.load %arg8[%c0_19, %c0_20] : memref<128x1xi32, #tpu.memory_space<vmem>>, vector<128x1xi32>
    %c0_21 = arith.constant 0 : index
    %c0_22 = arith.constant 0 : index
    %23 = vector.load %arg9[%c0_21, %c0_22] : memref<1x128xi32, #tpu.memory_space<vmem>>, vector<1x128xi32>
    %24 = vector.broadcast %22 : vector<128x1xi32> to vector<128x128xi32>
    %25 = vector.broadcast %23 : vector<1x128xi32> to vector<128x128xi32>
    %26 = arith.cmpi eq, %24, %25 : vector<128x128xi32>
    %c0_23 = arith.constant 0 : index
    %c0_24 = arith.constant 0 : index
    %27 = vector.load %arg11[%c0_23, %c0_24] : memref<1x128xf32, #tpu.memory_space<vmem>>, vector<1x128xf32>
    %cst_25 = arith.constant 0xFF800000 : f32
    %28 = vector.broadcast %cst_25 : f32 to vector<128x128xf32>
    %29 = arith.select %26, %21, %28 : vector<128x128xi1>, vector<128x128xf32>
    %cst_26 = arith.constant dense<0xFF800000> : vector<128xf32>
    %30 = vector.multi_reduction <maximumf>, %29, %cst_26 [0] : vector<128x128xf32> to vector<128xf32>
    %31 = vector.shape_cast %30 : vector<128xf32> to vector<1x128xf32>
    %32 = arith.maximumf %27, %31 : vector<1x128xf32>
    %c0_27 = arith.constant 0 : index
    %c0_28 = arith.constant 0 : index
    %33 = vector.load %arg11[%c0_27, %c0_28] : memref<1x128xf32, #tpu.memory_space<vmem>>, vector<1x128xf32>
    tpu.vector_store %arg11[%c0_27, %c0_28], %32 {strides = array<i32>} : memref<1x128xf32, #tpu.memory_space<vmem>>, vector<1x128xf32>,
    %c0_29 = arith.constant 0 : index
    %c0_30 = arith.constant 0 : index
    %34 = vector.load %arg12[%c0_29, %c0_30] : memref<1x128xf32, #tpu.memory_space<vmem>>, vector<1x128xf32>
    %cst_31 = arith.constant 0x7F800000 : f32
    %35 = vector.broadcast %cst_31 : f32 to vector<128x128xf32>
    %36 = arith.select %26, %35, %21 : vector<128x128xi1>, vector<128x128xf32>
    %cst_32 = arith.constant dense<0x7F800000> : vector<128xf32>
    %37 = vector.multi_reduction <minimumf>, %36, %cst_32 [0] : vector<128x128xf32> to vector<128xf32>
    %38 = vector.shape_cast %37 : vector<128xf32> to vector<1x128xf32>
    %39 = arith.minimumf %34, %38 : vector<1x128xf32>
    %c0_33 = arith.constant 0 : index
    %c0_34 = arith.constant 0 : index
    %40 = vector.load %arg12[%c0_33, %c0_34] : memref<1x128xf32, #tpu.memory_space<vmem>>, vector<1x128xf32>
    tpu.vector_store %arg12[%c0_33, %c0_34], %39 {strides = array<i32>} : memref<1x128xf32, #tpu.memory_space<vmem>>, vector<1x128xf32>,
    %c0_i32_35 = arith.constant 0 : i32
    %41 = arith.cmpi eq, %arg1, %c0_i32_35 : i32
    %42 = arith.extui %41 : i1 to i32
    %c0_i32_36 = arith.constant 0 : i32
    %43 = arith.cmpi ne, %42, %c0_i32_36 : i32
    scf.if %43 {
      %c0_37 = arith.constant 0 : index
      %c0_38 = arith.constant 0 : index
      %44 = vector.load %arg11[%c0_37, %c0_38] : memref<1x128xf32, #tpu.memory_space<vmem>>, vector<1x128xf32>
      %cst_39 = arith.constant 9.99999996E-13 : f32
      %45 = vector.broadcast %cst_39 : f32 to vector<1x128xf32>
      %46 = arith.maximumf %44, %45 : vector<1x128xf32>
      %47 = math.sqrt %46 : vector<1x128xf32>
      %c0_40 = arith.constant 0 : index
      %c0_41 = arith.constant 0 : index
      %48 = vector.load %arg12[%c0_40, %c0_41] : memref<1x128xf32, #tpu.memory_space<vmem>>, vector<1x128xf32>
      %cst_42 = arith.constant 9.99999996E-13 : f32
      %49 = vector.broadcast %cst_42 : f32 to vector<1x128xf32>
      %50 = arith.maximumf %48, %49 : vector<1x128xf32>
      %51 = math.sqrt %50 : vector<1x128xf32>
      %52 = arith.subf %47, %51 : vector<1x128xf32>
      %cst_43 = arith.constant 3.000000e-01 : f32
      %53 = vector.broadcast %cst_43 : f32 to vector<1x128xf32>
      %54 = arith.addf %52, %53 : vector<1x128xf32>
      %cst_44 = arith.constant 0.000000e+00 : f32
      %55 = vector.broadcast %cst_44 : f32 to vector<1x128xf32>
      %56 = arith.maximumf %54, %55 : vector<1x128xf32>
      %c0_45 = arith.constant 0 : index
      %c0_46 = arith.constant 0 : index
      %57 = vector.load %arg10[%c0_45, %c0_46] : memref<1x128xf32, #tpu.memory_space<vmem>>, vector<1x128xf32>
      tpu.vector_store %arg10[%c0_45, %c0_46], %56 {strides = array<i32>} : memref<1x128xf32, #tpu.memory_space<vmem>>, vector<1x128xf32>,
    } else {
    }
    return
  }
  func.func @transform_0(%arg0: i32, %arg1: i32) -> (i32, i32) {
    %c0_i32 = arith.constant 0 : i32
    %c0_i32_0 = arith.constant 0 : i32
    return %arg1, %c0_i32 : i32, i32
  }
  func.func @transform_1(%arg0: i32, %arg1: i32) -> (i32, i32) {
    %c0_i32 = arith.constant 0 : i32
    %c0_i32_0 = arith.constant 0 : i32
    return %arg1, %c0_i32 : i32, i32
  }
  func.func @transform_2(%arg0: i32, %arg1: i32) -> (i32, i32) {
    %c0_i32 = arith.constant 0 : i32
    %c0_i32_0 = arith.constant 0 : i32
    return %c0_i32, %arg0 : i32, i32
  }
  func.func @transform_3(%arg0: i32, %arg1: i32) -> (i32, i32) {
    %c0_i32 = arith.constant 0 : i32
    %c0_i32_0 = arith.constant 0 : i32
    return %c0_i32, %arg0 : i32, i32
  }
  func.func @transform_4(%arg0: i32, %arg1: i32) -> (i32, i32) {
    %c0_i32 = arith.constant 0 : i32
    %c0_i32_0 = arith.constant 0 : i32
    return %arg1, %c0_i32 : i32, i32
  }
  func.func @transform_5(%arg0: i32, %arg1: i32) -> (i32, i32) {
    %c0_i32 = arith.constant 0 : i32
    %c0_i32_0 = arith.constant 0 : i32
    return %c0_i32, %arg0 : i32, i32
  }
  func.func @transform_6(%arg0: i32, %arg1: i32) -> (i32, i32) {
    %c0_i32 = arith.constant 0 : i32
    %c0_i32_0 = arith.constant 0 : i32
    return %arg1, %c0_i32 : i32, i32
  }
  func.func @transform_7(%arg0: i32, %arg1: i32) -> (i32, i32) {
    %c0_i32 = arith.constant 0 : i32
    %c0_i32_0 = arith.constant 0 : i32
    return %c0_i32, %arg0 : i32, i32
  }
  func.func @transform_8(%arg0: i32, %arg1: i32) -> (i32, i32) {
    %c0_i32 = arith.constant 0 : i32
    %c0_i32_0 = arith.constant 0 : i32
    return %c0_i32, %arg0 : i32, i32
  }
}

</mosaic_0001>

<bundles_post_ra>
// kernel: tpu_custom_call.1
= control target key start
LH: loop header
LB: loop body
LE: loop exit
PB: predicated region body
PF: predicated region fallthrough
CT: control target
= control target key end

     0   :  { %v1247_v2 = vmov 0   ;;  %s1793_s0 = inlined_call_operand.vmem [shape: bf16[128,128], index: 0, kind: input, shape index: {}]   ;;  %s1794_s1 = inlined_call_operand.vmem [shape: bf16[128,128], index: 1, kind: input, shape index: {}]   ;;  %s1795_s2 = inlined_call_operand.vmem [shape: bf16[128,128], index: 2, kind: input, shape index: {}]   ;;  %s1796_s3 = inlined_call_operand.vmem [shape: bf16[128,128], index: 3, kind: input, shape index: {}]   ;;  %s1797_s4 = inlined_call_operand.vmem [shape: f32[128,1], index: 4, kind: input, shape index: {}]   ;;  %s1798_s5 = inlined_call_operand.vmem [shape: f32[1,128], index: 5, kind: input, shape index: {}]   ;;  %s1799_s6 = inlined_call_operand.vmem [shape: s32[128,1], index: 6, kind: input, shape index: {}]   ;;  %s1800_s7 = inlined_call_operand.vmem [shape: s32[1,128], index: 7, kind: input, shape index: {}]   ;;  %s1801_s8 = inlined_call_operand.hbm [shape: f32[1,128], index: 8, kind: output, shape index: {}]  }
   0x1   :  { %v1187_v0 = vld [vmem:[%s1796_s3] sm:$0xff]   ;;  %1186 = vset.pattern.permute.xlu1 %v1247_v2  ;;  %1185 = vset.pattern.permute.xlu0 %v1247_v2  ;;  %v1189_v3 = vld [vmem:[%s1796_s3 + $0x8] sm:$0xff]   ;;  %v1191_v5 = vld [vmem:[%s1796_s3 + $0x10] sm:$0xff]  }
   0x2   :  { %v1302_v1 = vld [vmem:[%s1795_s2] sm:$0xff]   ;;  %1037 = vmatprep.subr.bf16.mxu1 %v1187_v0  ;;  %v1311_v4 = vld [vmem:[%s1795_s2 + $0x8] sm:$0xff]   ;;  %v1321_v6 = vld [vmem:[%s1795_s2 + $0x10] sm:$0xff]  }
   0x3   :  { %1069 = vmatprep.subr.bf16.mxu0 %v1302_v1  ;;  %1038 = vmatpush3.bf16.msra.mxu1 %v1187_v0  ;;  %v1193_v7 = vld [vmem:[%s1796_s3 + $0x18] sm:$0xff]   ;;  %v1195_v9 = vld [vmem:[%s1796_s3 + $0x20] sm:$0xff]   ;;  %v1197_v11 = vld [vmem:[%s1796_s3 + $0x28] sm:$0xff]  }
   0x4   :  { %1070 = vmatpush3.bf16.msra.mxu0 %v1302_v1  ;;  %1039 = vmatprep.subr.bf16.mxu1 %v1189_v3  ;;  %v1331_v8 = vld [vmem:[%s1795_s2 + $0x18] sm:$0xff]   ;;  %v1341_v10 = vld [vmem:[%s1795_s2 + $0x20] sm:$0xff]   ;;  %v1354_v13 = vld [vmem:[%s1795_s2 + $0x28] sm:$0xff]  }
   0x5   :  { %1071 = vmatprep.subr.bf16.mxu0 %v1311_v4  ;;  %v1203_v12 = vld [vmem:[%s1793_s0] sm:$0xff]   ;;  %v1199_v14 = vld [vmem:[%s1796_s3 + $0x30] sm:$0xff]   ;;  %v1201_v18 = vld [vmem:[%s1796_s3 + $0x38] sm:$0xff]  }
   0x6   :  { %1053 = vmatprep.mubr.bf16.mxu1 %v1203_v12  ;;  %1085 = vmatprep.mubr.bf16.mxu0 %v1203_v12  ;;  %v1364_v15 = vld [vmem:[%s1795_s2 + $0x30] sm:$0xff]   ;;  %v600_v17 = vld [vmem:[%s1797_s4] sm:$0xff]  ;;  %v603_v19 = vld [vmem:[%s1797_s4 + $0x18] sm:$0xff] }
   0x7   :  { %1040 = vmatpush3.bf16.msra.mxu1 %v1189_v3  ;;  %v602_v16 = vld [vmem:[%s1797_s4 + $0x10] sm:$0xff]  ;;  %v1383_v20 = vld [vmem:[%s1795_s2 + $0x38] sm:$0xff]   ;;  %619 = vperm.xlu0 %1185, %v600_v17   ;;  %v601_v21 = vld [vmem:[%s1797_s4 + $0x8] sm:$0xff] }
   0x8   :  { %1072 = vmatpush3.bf16.msra.mxu0 %v1311_v4  ;;  %1041 = vmatprep.subr.bf16.mxu1 %v1191_v5  ;;  %v605_v22 = vld [vmem:[%s1797_s4 + $0x28] sm:$0xff]  ;;  %v604_v24 = vld [vmem:[%s1797_s4 + $0x20] sm:$0xff]  ;;  %v1205_v25 = vld [vmem:[%s1793_s0 + $0x10] sm:$0xff]  }
   0x9   :  { %1073 = vmatprep.subr.bf16.mxu0 %v1321_v6  ;;  %629 = vperm.xlu1 %1186, %v602_v16   ;;  %v1204_v23 = vld [vmem:[%s1793_s0 + $0x8] sm:$0xff]   ;;  %v607_v26 = vld [vmem:[%s1797_s4 + $0x38] sm:$0xff]  ;;  %v606_v27 = vld [vmem:[%s1797_s4 + $0x30] sm:$0xff] }
   0xa   :  { %v1206_v28 = vld [vmem:[%s1793_s0 + $0x18] sm:$0xff]   ;;  %v609_v29 = vld [vmem:[%s1797_s4 + $0x48] sm:$0xff]  ;;  %v1207_v30 = vld [vmem:[%s1793_s0 + $0x20] sm:$0xff]  }
   0xb   :  { %1042 = vmatpush3.bf16.msra.mxu1 %v1191_v5  ;;  %624 = vperm.xlu0 %1185, %v601_v21   ;;  %v608_v31 = vld [vmem:[%s1797_s4 + $0x40] sm:$0xff] }
   0xc   :  { %1074 = vmatpush3.bf16.msra.mxu0 %v1321_v6  ;;  %1043 = vmatprep.subr.bf16.mxu1 %v1193_v7 }
   0xd   :  { %1075 = vmatprep.subr.bf16.mxu0 %v1331_v8  ;;  %634 = vperm.xlu1 %1186, %v603_v19  }
   0xf   :  { %1044 = vmatpush3.bf16.msra.mxu1 %v1193_v7  ;;  %639 = vperm.xlu0 %1185, %v604_v24  }
  0x10   :  { %1076 = vmatpush3.bf16.msra.mxu0 %v1331_v8  ;;  %1045 = vmatprep.subr.bf16.mxu1 %v1195_v9 }
  0x11   :  { %1077 = vmatprep.subr.bf16.mxu0 %v1341_v10  ;;  %644 = vperm.xlu1 %1186, %v605_v22  }
  0x13   :  { %1046 = vmatpush3.bf16.msra.mxu1 %v1195_v9  ;;  %649 = vperm.xlu0 %1185, %v606_v27  }
  0x14   :  { %1078 = vmatpush3.bf16.msra.mxu0 %v1341_v10  ;;  %1047 = vmatprep.subr.bf16.mxu1 %v1197_v11 }
  0x15   :  { %1079 = vmatprep.subr.bf16.mxu0 %v1354_v13  ;;  %654 = vperm.xlu1 %1186, %v607_v26  }
  0x17   :  { %1048 = vmatpush3.bf16.msra.mxu1 %v1197_v11 }
  0x18   :  { %1080 = vmatpush3.bf16.msra.mxu0 %v1354_v13  ;;  %1049 = vmatprep.subr.bf16.mxu1 %v1199_v14 }
  0x19   :  { %1081 = vmatprep.subr.bf16.mxu0 %v1364_v15  ;;  %664 = vperm.xlu1 %1186, %v609_v29  }
  0x1b   :  { %1050 = vmatpush3.bf16.msra.mxu1 %v1199_v14 }
  0x1c   :  { %1082 = vmatpush3.bf16.msra.mxu0 %v1364_v15  ;;  %1051 = vmatprep.subr.bf16.mxu1 %v1201_v18 }
  0x1d   :  { %1083 = vmatprep.subr.bf16.mxu0 %v1383_v20 }
  0x1f   :  { %1052 = vmatpush3.bf16.msra.mxu1 %v1201_v18 }
  0x20   :  { %1084 = vmatpush3.bf16.msra.mxu0 %v1383_v20  ;;  %1133 = vmatprep.subr.bf16.mxu1 %v1302_v1 }
  0x21   :  { %1101 = vmatprep.subr.bf16.mxu0 %v1302_v1 }
  0x22   :  { %1054 = vmatmul.mubr.bf16.vlgmr.msra.gmra.mrb[0].mxu1 %v1204_v23 }
  0x23   :  { %1086 = vmatmul.mubr.bf16.vlgmr.msra.gmra.mrb[0].mxu0 %v1204_v23  ;;  %1141 = vmatpush3.bf16.msra.mxu1 %v1302_v1 }
  0x24   :  { %1102 = vmatpush3.bf16.msra.mxu0 %v1302_v1  ;;  %1134 = vmatprep.subr.bf16.mxu1 %v1311_v4 }
  0x25   :  { %1103 = vmatprep.subr.bf16.mxu0 %v1311_v4  ;;  %1057 = vmatprep.mubr.bf16.mxu1 %v1205_v25 }
  0x26   :  { %1089 = vmatprep.mubr.bf16.mxu0 %v1205_v25 }
  0x27   :  { %1142 = vmatpush3.bf16.msra.mxu1 %v1311_v4 }
  0x28   :  { %1104 = vmatpush3.bf16.msra.mxu0 %v1311_v4  ;;  %1135 = vmatprep.subr.bf16.mxu1 %v1321_v6 }
  0x29   :  { %1105 = vmatprep.subr.bf16.mxu0 %v1321_v6 }
  0x2a   :  { %1058 = vmatmul.mubr.bf16.gmra.mrb[4].mxu1 %v1206_v28 }
  0x2b   :  { %1090 = vmatmul.mubr.bf16.gmra.mrb[4].mxu0 %v1206_v28  ;;  %1143 = vmatpush3.bf16.msra.mxu1 %v1321_v6 }
  0x2c   :  { %13 = vsyncpa [#allocation5], 0  ;;  %1106 = vmatpush3.bf16.msra.mxu0 %v1321_v6  ;;  %1136 = vmatprep.subr.bf16.mxu1 %v1331_v8  ;;  %v611_v32 = vld [vmem:[%s1797_s4 + $0x58] sm:$0xff]  ;;  %v1208_v33 = vld [vmem:[%s1793_s0 + $0x28] sm:$0xff]   ;;  %v1248_v1 = vmov -inf   ;;  %v1249_v2 = vmov inf  }
  0x2d   :  { %1107 = vmatprep.subr.bf16.mxu0 %v1331_v8  ;;  %1061 = vmatprep.mubr.bf16.mxu1 %v1207_v30  ;;  %v610_v34 = vld [vmem:[%s1797_s4 + $0x50] sm:$0xff]  ;;  %v752_v36 = vld [vmem:[%s1799_s6 + $0x8] sm:$0xff]  ;;  %v751_v37 = vld [vmem:[%s1799_s6] sm:$0xff]  ;;  %35 = vst [vmem:[#allocation2] sm:$0x1] %v1248_v1 }
  0x2e   :  { %1093 = vmatprep.mubr.bf16.mxu0 %v1207_v30  ;;  %659 = vperm.xlu0 %1185, %v608_v31   ;;  %v1209_v35 = vld [vmem:[%s1793_s0 + $0x30] sm:$0xff]   ;;  %v1210_v38 = vld [vmem:[%s1793_s0 + $0x38] sm:$0xff]   ;;  %v1211_v40 = vld [vmem:[%s1794_s1] sm:$0xff]   ;;  %36 = vst [vmem:[#allocation3] sm:$0x1] %v1249_v2 }
  0x2f   :  { %1144 = vmatpush3.bf16.msra.mxu1 %v1331_v8  ;;  %674 = vperm.xlu1 %1186, %v611_v32   ;;  %v754_v39 = vld [vmem:[%s1799_s6 + $0x18] sm:$0xff]  ;;  %v1212_v41 = vld [vmem:[%s1794_s1 + $0x20] sm:$0xff]   ;;  %v753_v42 = vld [vmem:[%s1799_s6 + $0x10] sm:$0xff] }
  0x30   :  { %1108 = vmatpush3.bf16.msra.mxu0 %v1331_v8  ;;  %1137 = vmatprep.subr.bf16.mxu1 %v1341_v10  ;;  %v756_v43 = vld [vmem:[%s1799_s6 + $0x28] sm:$0xff]  ;;  %v1216_v46 = vld [vmem:[%s1794_s1 + $0x30] sm:$0xff]   ;;  %v755_v47 = vld [vmem:[%s1799_s6 + $0x20] sm:$0xff] }
  0x31   :  { %1109 = vmatprep.subr.bf16.mxu0 %v1341_v10  ;;  %v1214_v44 = vld [vmem:[%s1794_s1 + $0x28] sm:$0xff]   ;;  %v1215_v48 = vld [vmem:[%s1794_s1 + $0x10] sm:$0xff]   ;;  %v758_v49 = vld [vmem:[%s1799_s6 + $0x38] sm:$0xff] }
  0x32   :  { %1062 = vmatmul.mubr.bf16.gmra.mrb[8].mxu1 %v1208_v33  ;;  %669 = vperm.xlu0 %1185, %v610_v34   ;;  %v1213_v45 = vld [vmem:[%s1794_s1 + $0x8] sm:$0xff]   ;;  %v757_v50 = vld [vmem:[%s1799_s6 + $0x30] sm:$0xff]  ;;  %v1218_v52 = vld [vmem:[%s1794_s1 + $0x38] sm:$0xff]  }
  0x33   :  { %1094 = vmatmul.mubr.bf16.gmra.mrb[8].mxu0 %v1208_v33  ;;  %1145 = vmatpush3.bf16.msra.mxu1 %v1341_v10  ;;  %v613_v51 = vld [vmem:[%s1797_s4 + $0x68] sm:$0xff]  ;;  %v1217_v53 = vld [vmem:[%s1794_s1 + $0x18] sm:$0xff]   ;;  %v612_v54 = vld [vmem:[%s1797_s4 + $0x60] sm:$0xff] }
  0x34   :  { %1110 = vmatpush3.bf16.msra.mxu0 %v1341_v10  ;;  %1138 = vmatprep.subr.bf16.mxu1 %v1354_v13  ;;  %v615_v55 = vld [vmem:[%s1797_s4 + $0x78] sm:$0xff]  ;;  %v614_v56 = vld [vmem:[%s1797_s4 + $0x70] sm:$0xff]  ;;  %v760_v57 = vld [vmem:[%s1799_s6 + $0x48] sm:$0xff] }
  0x35   :  { %1111 = vmatprep.subr.bf16.mxu0 %v1354_v13  ;;  %1065 = vmatprep.mubr.bf16.mxu1 %v1209_v35  ;;  %v759_v58 = vld [vmem:[%s1799_s6 + $0x40] sm:$0xff]  ;;  %v762_v59 = vld [vmem:[%s1799_s6 + $0x58] sm:$0xff]  ;;  %v761_v60 = vld [vmem:[%s1799_s6 + $0x50] sm:$0xff] }
  0x36   :  { %1097 = vmatprep.mubr.bf16.mxu0 %v1209_v35  ;;  %772 = vperm.xlu1 %1186, %v752_v36   ;;  %v764_v61 = vld [vmem:[%s1799_s6 + $0x68] sm:$0xff]  ;;  %v763_v62 = vld [vmem:[%s1799_s6 + $0x60] sm:$0xff]  ;;  %v766_v63 = vld [vmem:[%s1799_s6 + $0x78] sm:$0xff] }
  0x37   :  { %1146 = vmatpush3.bf16.msra.mxu1 %v1354_v13  ;;  %769 = vperm.xlu0 %1185, %v751_v37   ;;  %v765_v0 = vld [vmem:[%s1799_s6 + $0x70] sm:$0xff] }
  0x38   :  { %1112 = vmatpush3.bf16.msra.mxu0 %v1354_v13  ;;  %1139 = vmatprep.subr.bf16.mxu1 %v1364_v15 }
  0x39   :  { %1113 = vmatprep.subr.bf16.mxu0 %v1364_v15 }
  0x3a   :  { %1066 = vmatmul.mubr.bf16.gmra.mrb[12].mxu1 %v1210_v38  ;;  %778 = vperm.xlu1 %1186, %v754_v39  }
  0x3b   :  { %1098 = vmatmul.mubr.bf16.gmra.mrb[12].mxu0 %v1210_v38  ;;  %1147 = vmatpush3.bf16.msra.mxu1 %v1364_v15 }
  0x3c   :  { %1114 = vmatpush3.bf16.msra.mxu0 %v1364_v15  ;;  %1140 = vmatprep.subr.bf16.mxu1 %v1383_v20 }
  0x3d   :  { %1115 = vmatprep.subr.bf16.mxu0 %v1383_v20  ;;  %1117 = vmatprep.mubr.bf16.mxu0 %v1211_v40 }
  0x3e   :  { %1125 = vmatprep.mubr.bf16.mxu1 %v1212_v41  ;;  %775 = vperm.xlu0 %1185, %v753_v42  }
  0x3f   :  { %1148 = vmatpush3.bf16.msra.mxu1 %v1383_v20  ;;  %784 = vperm.xlu1 %1186, %v756_v43  }
  0x40   :  { %1116 = vmatpush3.bf16.msra.mxu0 %v1383_v20 }
  0x42   :  { %1126 = vmatmul.mubr.bf16.vlgmr.msra.gmra.mrb[16].mxu1 %v1214_v44  ;;  %781 = vperm.xlu0 %1185, %v755_v47  }
  0x43   :  { %1118 = vmatmul.mubr.bf16.vlgmr.msra.gmra.mrb[0].mxu0 %v1213_v45  ;;  %1129 = vmatprep.mubr.bf16.mxu1 %v1216_v46 }
  0x44   :  { %1121 = vmatprep.mubr.bf16.mxu0 %v1215_v48  ;;  %790 = vperm.xlu1 %1186, %v758_v49  }
  0x46   :  { %787 = vperm.xlu0 %1185, %v757_v50  }
  0x48   :  { %684 = vperm.xlu1 %1186, %v613_v51  }
  0x4a   :  { %1130 = vmatmul.mubr.bf16.gmra.mrb[20].mxu1 %v1218_v52  ;;  %679 = vperm.xlu0 %1185, %v612_v54  }
  0x4b   :  { %1122 = vmatmul.mubr.bf16.gmra.mrb[4].mxu0 %v1217_v53 }
  0x4c   :  { %694 = vperm.xlu1 %1186, %v615_v55   ;;  %v987_v55 = vld [vmem:[%s1798_s5] ss:$0 sm:$0xff]  ;;  %s1250_s5 = smov [#allocation4]  }
  0x4e   :  { %689 = vperm.xlu0 %1185, %v614_v56  }
  0x50   :  { %796 = vperm.xlu1 %1186, %v760_v57  }
  0x52   :  { %793 = vperm.xlu0 %1185, %v759_v58  }
  0x54   :  { %802 = vperm.xlu1 %1186, %v762_v59  }
  0x56   :  { %799 = vperm.xlu0 %1185, %v761_v60  }
  0x58   :  { %808 = vperm.xlu1 %1186, %v764_v61  }
  0x5a   :  { %805 = vperm.xlu0 %1185, %v763_v62  }
  0x5c   :  { %814 = vperm.xlu1 %1186, %v766_v63  }
  0x5e   :  { %811 = vperm.xlu0 %1185, %v765_v0  }
  0x86   :  { %v620_v3 = vpop.permute.xlu0 %619 }
  0x87   :  { %v703_v63 = vadd.f32 %v987_v55, %v620_v3 }
  0x88   :  { %v630_v5 = vpop.permute.xlu1 %629 }
  0x89   :  { %v705_v62 = vadd.f32 %v987_v55, %v630_v5 }
  0x8a   :  { %v625_v4 = vpop.permute.xlu0 %624 }
  0x8b   :  { %v1611_v1 = vadd.f32 %v987_v55, %v625_v4 }
  0x8c   :  { %v635_v7 = vpop.permute.xlu1 %634 }
  0x8d   :  { %v706_v0 = vadd.f32 %v987_v55, %v635_v7 }
  0x8e   :  { %v1552_v6 = vpop.permute.xlu0 %639 }
  0x90   :  { %v645_v9 = vpop.permute.xlu1 %644 }
  0x91   :  { %v1613_v2 = vadd.f32 %v987_v55, %v645_v9 }
  0x92   :  { %v1554_v8 = vpop.permute.xlu0 %649 }
  0x93   :  { %v1628_v5 = vadd.f32 %v987_v55, %v1554_v8 }
  0x94   :  { %v655_v11 = vpop.permute.xlu1 %654 }
  0x98   :  { %v665_v13 = vpop.permute.xlu1 %664 }
  0x99   :  { %v1630_v3 = vadd.f32 %v987_v55, %v665_v13 }
  0xad   :  { %v1556_v10 = vpop.permute.xlu0 %659 }
  0xae   :  { %v675_v15 = vpop.permute.xlu1 %674  ;;  %v711_v9 = vadd.f32 %v987_v55, %v1556_v10 }
  0xb1   :  { %v1558_v12 = vpop.permute.xlu0 %669 }
  0xb5   :  { %v1564_v17 = vpop.permute.xlu1 %772 }
  0xb6   :  { %v1560_v14 = vpop.permute.xlu0 %769 }
  0xb9   :  { %v1568_v19 = vpop.permute.xlu1 %778 }
  0xbd   :  { %v1562_v16 = vpop.permute.xlu0 %775 }
  0xbe   :  { %v1578_v24 = vpop.permute.xlu1 %784 }
  0xc1   :  { %v1566_v18 = vpop.permute.xlu0 %781 }
  0xc3   :  { %v1586_v28 = vpop.permute.xlu1 %790 }
  0xc5   :  { %v1570_v20 = vpop.permute.xlu0 %787 }
  0xc7   :  { %v685_v33 = vpop.permute.xlu1 %684 }
  0xc9   :  { %v1582_v26 = vpop.permute.xlu0 %679 }
  0xca   :  { %v1646_v10 = vadd.f32 %v987_v55, %v1582_v26 }
  0xcb   :  { %v695_v47 = vpop.permute.xlu1 %694 }
  0xcd   :  { %v1590_v30 = vpop.permute.xlu0 %689 }
  0xcf   :  { %v1632_v4 = vpop.permute.xlu1 %796 }
  0xd1   :  { %v1596_v34 = vpop.permute.xlu0 %793 }
  0xd5   :  { %v1598_v48 = vpop.permute.xlu0 %799 }
  0xf5   :  { %v1572_v21 = vpop.f32.mrb[0].mxu1 }
  0xf6   :  { %v1574_v22 = vpop.f32.mrb[1].mxu1 }
  0xf7   :  { %v1576_v23 = vpop.f32.mrb[2].mxu1 }
  0xf8   :  { %v1580_v25 = vpop.f32.mrb[3].mxu1 }
  0xfd   :  { %v1584_v27 = vpop.f32.mrb[4].mxu1 }
  0xfe   :  { %v1588_v29 = vpop.f32.mrb[5].mxu1 }
  0xff   :  { %v1592_v31 = vpop.f32.mrb[6].mxu1 }
 0x100   :  { %v1594_v32 = vpop.f32.mrb[7].mxu1 }
 0x105   :  { %v1063_v35 = vpop.f32.mrb[8].mxu1 }
 0x106   :  { %v1095_v36 = vpop.f32.mrb[8].mxu0  ;;  %v247_v37 = vpop.f32.mrb[9].mxu1 }
 0x107   :  { %v401_v38 = vadd.f32 %v1095_v36, %v1063_v35  ;;  %v392_v39 = vpop.f32.mrb[9].mxu0  ;;  %v1064_v40 = vpop.f32.mrb[10].mxu1  ;;  %v1618_v35 = vld [vmem:[%s1800_s7] ss:$0 sm:$0xff]  ;;  %s947_s7 = sshll.u32 %s1250_s5, 4  ;;  %s948_s7 = int_to_ptr.vmem [resolvable:$true] %s947_s7 }
 0x108   :  { %v393_v41 = vadd.f32 %v392_v39, %v247_v37  ;;  %v1096_v42 = vpop.f32.mrb[10].mxu0  ;;  %v250_v43 = vpop.f32.mrb[11].mxu1  ;;  %v1623_v37 = vadd.f32 %v987_v55, %v1552_v6  ;;  %v1625_v39 = vadd.f32 %v987_v55, %v655_v11  ;;  %vm820_vm0 = vcmp.eq.s32.totalorder %v1560_v14, %v1618_v35  ;;  %s1223_s14 = scalar_lea.vmem %s948_s7, 16  ;;  %s1227_s0 = scalar_lea.vmem %s948_s7, 32 }
 0x109   :  { %v404_v44 = vadd.f32 %v1096_v42, %v1064_v40  ;;  %v395_v45 = vpop.f32.mrb[11].mxu0  ;;  %v1620_v36 = vpop.permute.xlu0 %805  ;;  %v714_v40 = vadd.f32 %v987_v55, %v675_v15  ;;  %v713_v42 = vadd.f32 %v987_v55, %v1558_v12  ;;  %vm822_vm1 = vcmp.eq.s32.totalorder %v1562_v16, %v1618_v35  ;;  %p1224_p0 = scmp.ne.s32.totalorder %s948_s7, %s1223_s14  ;;  %p1228_p1 = scmp.lt.s32.totalorder %s948_s7, %s948_s7 }
 0x10a   :  { %v396_v46 = vadd.f32 %v395_v45, %v250_v43  ;;  %v1640_v6 = vadd.f32 %v987_v55, %v685_v33  ;;  %vm823_vm2 = vcmp.eq.s32.totalorder %v1568_v19, %v1618_v35  ;;  %vm826_vm3 = vcmp.eq.s32.totalorder %v1570_v20, %v1618_v35  ;;  %p1229_p2 = scmp.lt.s32.totalorder %s1227_s0, %s1223_s14 }
 0x10b   :  { %vm828_vm4 = vcmp.eq.s32.totalorder %v1596_v34, %v1618_v35  ;;  %vm830_vm6 = vcmp.eq.s32.totalorder %v1598_v48, %v1618_v35  ;;  %vm824_vm8 = vcmp.eq.s32.totalorder %v1566_v18, %v1618_v35  ;;  %vm827_vm9 = vcmp.eq.s32.totalorder %v1586_v28, %v1618_v35 }
 0x10c   :  { %vm832_vm10 = vcmp.eq.s32.totalorder %v1620_v36, %v1618_v35  ;;  %vm821_vm11 = vcmp.eq.s32.totalorder %v1564_v17, %v1618_v35  ;;  %vm825_vm12 = vcmp.eq.s32.totalorder %v1578_v24, %v1618_v35  ;;  %vm829_vm14 = vcmp.eq.s32.totalorder %v1632_v4, %v1618_v35  ;;  %p1230_p3 = por %p1229_p2, %p1228_p1 }
 0x10d   :  { %v1067_v49 = vpop.f32.mrb[12].mxu1 }
 0x10e   :  { %v1099_v50 = vpop.f32.mrb[12].mxu0  ;;  %v263_v51 = vpop.f32.mrb[13].mxu1  ;;  %p1231_p4 = pnand %p1230_p3, %p1224_p0 }
 0x10f   :  { %v1600_v52 = vadd.f32 %v1099_v50, %v1067_v49  ;;  %v408_v53 = vpop.f32.mrb[13].mxu0  ;;  %v1068_v54 = vpop.f32.mrb[14].mxu1 }
 0x110   :  { %v1605_v56 = vadd.f32 %v408_v53, %v263_v51  ;;  %v1100_v57 = vpop.f32.mrb[14].mxu0  ;;  %v266_v58 = vpop.f32.mrb[15].mxu1 }
 0x111   :  { %v1607_v59 = vadd.f32 %v1100_v57, %v1068_v54  ;;  %v411_v60 = vpop.f32.mrb[15].mxu0 }
 0x112   :  { %v1609_v61 = vadd.f32 %v411_v60, %v266_v58 }
 0x115   :  { %v1127_v7 = vpop.f32.mrb[16].mxu1 }
 0x116   :  { %v1119_v43 = vpop.f32.mrb[0].mxu0  ;;  %v594_v45 = vadd.f32 %v1127_v7, %v401_v38  ;;  %v553_v49 = vpop.f32.mrb[17].mxu1 }
 0x117   :  { %v1149_v8 = vadd.f32 %v1119_v43, %v1572_v21  ;;  %v521_v11 = vpop.f32.mrb[1].mxu0  ;;  %v592_v13 = vadd.f32 %v553_v49, %v393_v41  ;;  %v1128_v50 = vpop.f32.mrb[18].mxu1  ;;  %v1653_v49 = vadd.f32 %v987_v55, %v695_v47 }
 0x118   :  { %v729_v12 = vmul.f32 2.0, %v594_v45  ;;  %v1150_v15 = vadd.f32 %v521_v11, %v1574_v22  ;;  %v1120_v38 = vpop.f32.mrb[2].mxu0  ;;  %v595_v51 = vadd.f32 %v1128_v50, %v404_v44  ;;  %v556_v53 = vpop.f32.mrb[19].mxu1 }
 0x119   :  { %v721_v54 = vmul.f32 2.0, %v1149_v8  ;;  %v727_v33 = vmul.f32 2.0, %v592_v13  ;;  %v1151_v57 = vadd.f32 %v1120_v38, %v1576_v23  ;;  %v524_v21 = vpop.f32.mrb[3].mxu0  ;;  %v593_v58 = vadd.f32 %v556_v53, %v396_v46  ;;  %v1650_v41 = vpop.permute.xlu0 %811 }
 0x11a   :  { %v745_v60 = vsub.f32 %v713_v42, %v729_v12  ;;  %v719_v7 = vmul.f32 2.0, %v1150_v15  ;;  %v730_v43 = vmul.f32 2.0, %v595_v51  ;;  %v1152_v26 = vadd.f32 %v524_v21, %v1580_v25  ;;  %v1655_v45 = vpop.permute.xlu1 %802 }
 0x11b   :  { %v737_v22 = vsub.f32 %v705_v62, %v721_v54  ;;  %v743_v44 = vsub.f32 %v711_v9, %v727_v33  ;;  %v722_v11 = vmul.f32 2.0, %v1151_v57  ;;  %v717_v23 = vadd.f32 %v987_v55, %v1590_v30 }
 0x11c   :  { %vm831_vm5 = vcmp.eq.s32.totalorder %v1655_v45, %v1618_v35  ;;  %v735_v46 = vsub.f32 %v703_v63, %v719_v7  ;;  %vm834_vm7 = vcmp.eq.s32.totalorder %v1650_v41, %v1618_v35  ;;  %v1668_v25 = vsub.f32 %v714_v40, %v730_v43 }
 0x11d   :  { %v1670_v47 = vmul.f32 2.0, %v593_v58  ;;  %v1131_v62 = vpop.f32.mrb[20].mxu1  ;;  %v839_v30 = vsel %vm822_vm1, %v737_v22, -inf  ;;  %v847_v55 = vsel %vm830_vm6, %v745_v60, -inf  ;;  %v887_v63 = vsel %vm830_vm6, inf, %v745_v60 }
 0x11e   :  { %v738_v9 = vsub.f32 %v706_v0, %v722_v11  ;;  %v1123_v42 = vpop.f32.mrb[4].mxu0  ;;  %v569_v48 = vpop.f32.mrb[21].mxu1  ;;  %v879_v40 = vsel %vm822_vm1, inf, %v737_v22  ;;  %v845_v8 = vsel %vm828_vm4, %v743_v44, -inf  ;;  %v720_v13 = vmul.f32 2.0, %v1152_v26 }
 0x11f   :  { %v1153_v50 = vadd.f32 %v1123_v42, %v1584_v27  ;;  %v537_v12 = vpop.f32.mrb[5].mxu0  ;;  %v1132_v15 = vpop.f32.mrb[22].mxu1  ;;  %v837_v16 = vsel %vm820_vm0, %v735_v46, -inf  ;;  %v885_v0 = vsel %vm828_vm4, inf, %v743_v44  ;;  %v598_v38 = vadd.f32 %v1131_v62, %v1600_v52 }
 0x120   :  { %v1154_v27 = vadd.f32 %v537_v12, %v1588_v29  ;;  %v1124_v51 = vpop.f32.mrb[6].mxu0  ;;  %v572_v53 = vpop.f32.mrb[23].mxu1  ;;  %v877_v54 = vsel %vm820_vm0, inf, %v735_v46  ;;  %v840_v33 = vsel %vm823_vm2, %v738_v9, -inf  ;;  %v848_v34 = vsel %vm831_vm5, %v1668_v25, -inf }
 0x121   :  { %v725_v57 = vmul.f32 2.0, %v1153_v50  ;;  %v540_v21 = vpop.f32.mrb[7].mxu0  ;;  %v733_v52 = vmul.f32 2.0, %v598_v38  ;;  %v596_v29 = vadd.f32 %v569_v48, %v1605_v56  ;;  %v1155_v60 = vadd.f32 %v1124_v51, %v1592_v31  ;;  %v1714_v22 = vpop.permute.xlu1 %808 }
 0x122   :  { %v723_v58 = vmul.f32 2.0, %v1154_v27  ;;  %v880_v14 = vsel %vm823_vm2, inf, %v738_v9  ;;  %v736_v7 = vsub.f32 %v1611_v1, %v720_v13  ;;  %v599_v26 = vadd.f32 %v1132_v15, %v1607_v59 }
 0x123   :  { %v741_v43 = vsub.f32 %v1628_v5, %v725_v57  ;;  %v749_v44 = vsub.f32 %v717_v23, %v733_v52  ;;  %v731_v46 = vmul.f32 2.0, %v596_v29  ;;  %v726_v62 = vmul.f32 2.0, %v1155_v60 }
 0x124   :  { %v739_v11 = vsub.f32 %v1623_v37, %v723_v58  ;;  %v734_v56 = vmul.f32 2.0, %v599_v26  ;;  %v1156_v1 = vadd.f32 %v540_v21, %v1594_v32  ;;  %v888_v36 = vsel %vm831_vm5, inf, %v1668_v25 }
 0x125   :  { %v843_v31 = vsel %vm826_vm3, %v741_v43, -inf  ;;  %v883_v19 = vsel %vm826_vm3, inf, %v741_v43  ;;  %v851_v37 = vsel %vm834_vm7, %v749_v44, -inf  ;;  %v891_v23 = vsel %vm834_vm7, inf, %v749_v44 }
 0x126   :  { %v855_v59 = vmax.f32 %v839_v30, %v843_v31  ;;  %v895_v5 = vmin.f32 %v879_v40, %v883_v19  ;;  %v841_v20 = vsel %vm824_vm8, %v739_v11, -inf  ;;  %v881_v32 = vsel %vm824_vm8, inf, %v739_v11 }
 0x127   :  { %v747_v30 = vsub.f32 %v1646_v10, %v731_v46  ;;  %v742_v9 = vsub.f32 %v1625_v39, %v726_v62  ;;  %v853_v40 = vmax.f32 %v837_v16, %v841_v20  ;;  %v893_v41 = vmin.f32 %v877_v54, %v881_v32  ;;  %v815_v10 = vpop.permute.xlu1 %814 }
 0x128   :  { %v859_v42 = vmax.f32 %v855_v59, %v847_v55  ;;  %v899_v48 = vmin.f32 %v895_v5, %v887_v63  ;;  %v750_v27 = vsub.f32 %v1653_v49, %v734_v56  ;;  %v724_v51 = vmul.f32 2.0, %v1156_v1 }
 0x129   :  { %v849_v13 = vsel %vm832_vm10, %v747_v30, -inf  ;;  %v889_v50 = vsel %vm832_vm10, inf, %v747_v30  ;;  %v844_v18 = vsel %vm827_vm9, %v742_v9, -inf  ;;  %v884_v39 = vsel %vm827_vm9, inf, %v742_v9  ;;  %v876_v30 = vld [vmem:[#allocation3] sm:$0x1] }
 0x12a   :  { %v863_v55 = vmax.f32 %v859_v42, %v851_v37  ;;  %v903_v63 = vmin.f32 %v899_v48, %v891_v23  ;;  %v857_v12 = vmax.f32 %v853_v40, %v845_v8  ;;  %v897_v15 = vmin.f32 %v893_v41, %v885_v0 }
 0x12b   :  { %v856_v16 = vmax.f32 %v840_v33, %v844_v18  ;;  %v896_v38 = vmin.f32 %v880_v14, %v884_v39  ;;  %v597_v28 = vadd.f32 %v572_v53, %v1609_v61  ;;  %vm835_vm13 = vcmp.eq.s32.totalorder %v815_v10, %v1618_v35 }
 0x12c   :  { %v861_v54 = vmax.f32 %v857_v12, %v849_v13  ;;  %v901_v57 = vmin.f32 %v897_v15, %v889_v50  ;;  %v744_v8 = vsub.f32 %v1630_v3, %v1670_v47  ;;  %v852_v21 = vsel %vm835_vm13, %v750_v27, -inf }
 0x12d   :  { %v860_v0 = vmax.f32 %v856_v16, %v848_v34  ;;  %v900_v33 = vmin.f32 %v896_v38, %v888_v36  ;;  %v892_v52 = vsel %vm835_vm13, inf, %v750_v27  ;;  %v740_v49 = vsub.f32 %v1613_v2, %v724_v51 }
 0x12e   :  { %v732_v58 = vmul.f32 2.0, %v597_v28  ;;  %v838_v45 = vsel %vm821_vm11, %v736_v7, -inf  ;;  %v878_v3 = vsel %vm821_vm11, inf, %v736_v7  ;;  %v846_v14 = vsel %vm829_vm14, %v744_v8, -inf }
 0x12f   :  { %v864_v61 = vmax.f32 %v860_v0, %v852_v21  ;;  %v904_v25 = vmin.f32 %v900_v33, %v892_v52  ;;  %v842_v47 = vsel %vm825_vm12, %v740_v49, -inf  ;;  %v882_v2 = vsel %vm825_vm12, inf, %v740_v49 }
 0x130   :  { %v748_v4 = vsub.f32 %v1640_v6, %v732_v58  ;;  %v854_v29 = vmax.f32 %v838_v45, %v842_v47  ;;  %v894_v60 = vmin.f32 %v878_v3, %v882_v2  ;;  %v886_v43 = vsel %vm829_vm14, inf, %v744_v8 }
 0x131   :  { %v866_v53 = vmax.f32 %v863_v55, %v864_v61  ;;  %v906_v34 = vmin.f32 %v903_v63, %v904_v25  ;;  %vm833_vm15 = vcmp.eq.s32.totalorder %v1714_v22, %v1618_v35  ;;  %v836_v22 = vld [vmem:[#allocation2] sm:$0x1] }
 0x132   :  { %v858_v17 = vmax.f32 %v854_v29, %v846_v14  ;;  %v898_v7 = vmin.f32 %v894_v60, %v886_v43  ;;  %v850_v26 = vsel %vm833_vm15, %v748_v4, -inf  ;;  %v890_v44 = vsel %vm833_vm15, inf, %v748_v4 }
 0x134   :  { %v862_v11 = vmax.f32 %v858_v17, %v850_v26  ;;  %v902_v46 = vmin.f32 %v898_v7, %v890_v44 }
 0x136   :  { %v865_v62 = vmax.f32 %v861_v54, %v862_v11  ;;  %v905_v24 = vmin.f32 %v901_v57, %v902_v46 }
 0x138   :  { %v867_v31 = vmax.f32 %v865_v62, %v866_v53  ;;  %v907_v19 = vmin.f32 %v905_v24, %v906_v34 }
 0x13a   :  { %v868_v6 = vrot.slane %v867_v31, 4  ;;  %v908_v56 = vrot.slane %v907_v19, 4 }
 0x13c   :  { %v869_v1 = vmax.f32 %v867_v31, %v868_v6  ;;  %v909_v59 = vmin.f32 %v907_v19, %v908_v56 }
 0x13e   :  { %v870_v5 = vrot.slane %v869_v1, 2  ;;  %v910_v37 = vrot.slane %v909_v59, 2 }
 0x140   :  { %v871_v23 = vmax.f32 %v869_v1, %v870_v5  ;;  %v911_v20 = vmin.f32 %v909_v59, %v910_v37 }
 0x142   :  { %v872_v32 = vrot.slane %v871_v23, 1  ;;  %v912_v35 = vrot.slane %v911_v20, 1 }
 0x144   :  { %v873_v9 = vmax.f32 %v871_v23, %v872_v32  ;;  %v913_v42 = vmin.f32 %v911_v20, %v912_v35 }
 0x146   :  { %v874_v48 = vmax.f32 %v836_v22, %v873_v9  ;;  %v914_v40 = vmin.f32 %v876_v30, %v913_v42 }
 0x148   :  { %875 = vst [vmem:[#allocation2] sm:$0x1] %v874_v48  ;;  %915 = vst [vmem:[#allocation3] sm:$0x1] %v914_v40 }
 0x14f   :  { %v919_v41 = vld [vmem:[#allocation2] sm:$0x1]  ;;  %v928_v13 = vld [vmem:[#allocation3] sm:$0x1] }
 0x150   :  { %v920_v50 = vmax.f32 %v919_v41, 1e-12  ;;  %v929_v18 = vmax.f32 %v928_v13, 1e-12 }
 0x152   :  { %1219 = vrsqrt.f32 %v920_v50  ;;  %vm923_vm0 = vcmp.eq.f32.partialorder %v920_v50, inf  ;;  %v926_v63 = vand.u32 2147483648, %v920_v50  ;;  %vm925_vm1 = vcmp.eq.f32.partialorder %v920_v50, 0.0 }
 0x153   :  { %1221 = vrsqrt.f32 %v929_v18  ;;  %vm932_vm2 = vcmp.eq.f32.partialorder %v929_v18, inf  ;;  %v935_v16 = vand.u32 2147483648, %v929_v18  ;;  %vm934_vm3 = vcmp.eq.f32.partialorder %v929_v18, 0.0 }
 0x15c   :  { %v1220_v39 = vpop.eup %1219 }
 0x15d   :  { %v1222_v10 = vpop.eup %1221  ;;  %v922_v55 = vmul.f32 %v1220_v39, %v920_v50 }
 0x15e   :  { %v931_v12 = vmul.f32 %v1222_v10, %v929_v18 }
 0x15f   :  { %v924_v15 = vsel %vm923_vm0, %v920_v50, %v922_v55 }
 0x160   :  { %v927_v38 = vsel %vm925_vm1, %v926_v63, %v924_v15  ;;  %v933_v27 = vsel %vm932_vm2, %v929_v18, %v931_v12 }
 0x161   :  { %v936_v51 = vsel %vm934_vm3, %v935_v16, %v933_v27 }
 0x162   :  { %v937_v36 = vsub.f32 %v927_v38, %v936_v51 }
 0x164   :  { %v938_v54 = vadd.f32 0.3, %v937_v36 }
 0x166   :  { %v939_v57 = vmax.f32 %v938_v54, 0.0 }
 0x168   :  { %940 = vst [vmem:[#allocation4] sm:$0x1] %v939_v57 }
 0x169   :  { %1234 = shalt.err (!%p1231_p4)
}
 0x16a   :  { %s1235_s17 = scalar_lea.hbm %s1801_s8, 16 }
 0x16b   :  { %p1236_p5 = scmp.ne.s32.totalorder %s1801_s8, %s1235_s17  ;;  %p1239_p6 = scmp.lt.u32.totalorder %s1235_s17, %s1801_s8 }
 0x16d   :  { %p1241_p7 = pnand %p1239_p6, %p1236_p5 }
 0x16f   :  { %1244 = shalt.err (!%p1241_p7)
}
 0x170   :  { %950 = dma.vmem_to_hbm [thread:$0]  %s948_s7, 16, %s1801_s8, [#allocation5]  }
 0x171   :  { %1245 = dma.done.wait [#allocation5], 16  }
 0x172   :  { %1246 = vsyncadd [#allocation5], 4294967280 }
 0x173   :  { %954 = vsyncpa [#allocation5], 1 }

</bundles_post_ra>
